<compile_context>
chip_gen: v7x
topology: tpu7x:2x2x1
jax: 0.10.0
libtpu: 0.0.40
codegen_flags: <defaults>
</compile_context>

<pallas_src>
import functools

import jax
import jax.numpy as jnp
from jax import lax
from jax.experimental import pallas as pl
from jax.experimental.pallas import tpu as pltpu


# --------------------------- phase A: encode ---------------------------
# grid = (N, K):  n = batch (parallel), k = HW tile (arbitrary / reduction)

def _glore_encode_kernel(x_ref, wenc_ref, benc_ref, t_ref, v_ref, *, c_red):
    f32 = jnp.float32
    x = x_ref[...]                                   # (C_in, HW_T) bf16

    # fused phy + theta 1x1 convs (BN scale already folded into the weights)
    rt = jnp.dot(wenc_ref[...], x, preferred_element_type=f32)
    rt = jnp.maximum(rt + benc_ref[...], 0.0)        # (C_red + C_node, HW_T)

    r16 = rt[:c_red, :].astype(jnp.bfloat16)         # (C_red,  HW_T)
    t16 = rt[c_red:, :].astype(jnp.bfloat16)         # (C_node, HW_T)
    t_ref[...] = t16                                 # reused in phase B

    # V partial = r @ t^T (contract over the HW lane dim of both operands).
    # NOTE: implies an internal transpose of t before the MXU; at these tile
    # sizes it hides under MXU/DMA slack.
    v_tile = lax.dot_general(r16, t16, (((1,), (1,)), ((), ())),
                             preferred_element_type=f32)

    @pl.when(pl.program_id(1) == 0)
    def _init():
        v_ref[...] = jnp.zeros_like(v_ref)

    v_ref[...] += v_tile                             # resident accumulator


# --------------------------- phase B: decode ---------------------------
# grid = (N, K):  n = batch (parallel), k = HW tile (arbitrary)

def _glore_decode_kernel(v_ref, t_ref, x_ref, wnt_ref, bn_ref, wf_ref,
                         bdec_ref, we_ref, o_ref, weff_ref, *, c_red):
    f32 = jnp.float32
    b_dec = bdec_ref[...]                            # (C_red + C_in, 1) f32

    # Graph reasoning + extend-fold: tiny, once per batch, cached in VMEM.
    @pl.when(pl.program_id(1) == 0)
    def _reason():
        v = v_ref[...]                               # (C_red, C_node) f32
        # node_conv applied to V^T, algebraically relu(V @ Wn_f^T + bn_row);
        # Wn_f^T is pre-transposed on the host (wnt_ref).
        n_t = jnp.dot(v, wnt_ref[...], preferred_element_type=f32)
        n_t = jnp.maximum(n_t + bn_ref[...], 0.0)
        v1 = n_t + v                                 # residual inside GraphConv1d
        # feat_conv
        v2 = jnp.dot(wf_ref[...], v1, preferred_element_type=f32)
        v2 = jnp.maximum(v2 + b_dec[:c_red, :], 0.0)
        # fold the extend conv:  We @ (v2 @ t) == (We @ v2) @ t
        w_eff = jnp.dot(we_ref[...], v2.astype(jnp.bfloat16),
                        preferred_element_type=f32)  # (C_in, C_node)
        weff_ref[...] = w_eff.astype(jnp.bfloat16)

    # Single matmul per HW tile + bias + residual + final ReLU (f32).
    y = jnp.dot(weff_ref[...], t_ref[...], preferred_element_type=f32)
    o_ref[...] = jnp.maximum(y + b_dec[c_red:, :] + x_ref[...], 0.0)


# ------------------------------ wrapper ------------------------------

def _pick_hw_tile(hw):
    for t in (1024, 512, 256, 128):
        if hw % t == 0:
            return t
    return hw  # fall back to the full extent (exempt from the 128 rule)


@jax.jit
def glore_forward(x_nchw, params):
    """x_nchw: (N, C_in, H, W).  params: folded parameter dict."""
    N, C_in, H, W = x_nchw.shape
    HW = H * W
    C_red = params["wf"].shape[0]
    C_node = params["wn_t"].shape[0]
    hw_t = _pick_hw_tile(HW)
    K = HW // hw_t

    x32 = x_nchw.reshape(N, C_in, HW).astype(jnp.float32)
    x16 = x32.astype(jnp.bfloat16)   # matmul operand (half HBM/VMEM traffic)

    cparams = pltpu.CompilerParams(
        dimension_semantics=("parallel", "arbitrary"),
        vmem_limit_bytes=32 * 1024 * 1024)

    # ---- phase A: encode + V accumulation ----
    flops_a = 2 * N * HW * C_in * (C_red + C_node) + 2 * N * HW * C_red * C_node
    bytes_a = (N * C_in * HW * 2 + N * C_node * HW * 2 + N * C_red * C_node * 4
               + params["w_enc"].size * 2 + params["b_enc"].size * 4)
    t_arr, v_arr = pl.pallas_call(
        functools.partial(_glore_encode_kernel, c_red=C_red),
        out_shape=(jax.ShapeDtypeStruct((N, C_node, HW), jnp.bfloat16),
                   jax.ShapeDtypeStruct((N, C_red, C_node), jnp.float32)),
        grid=(N, K),
        in_specs=[
            pl.BlockSpec((None, C_in, hw_t), lambda n, k: (n, 0, k)),
            pl.BlockSpec((C_red + C_node, C_in), lambda n, k: (0, 0)),
            pl.BlockSpec((C_red + C_node, 1), lambda n, k: (0, 0)),
        ],
        out_specs=(
            pl.BlockSpec((None, C_node, hw_t), lambda n, k: (n, 0, k)),
            pl.BlockSpec((None, C_red, C_node), lambda n, k: (n, 0, 0)),
        ),
        compiler_params=cparams,
        cost_estimate=pl.CostEstimate(
            flops=int(flops_a), transcendentals=0,
            bytes_accessed=int(bytes_a)),
    )(x16, params["w_enc"], params["b_enc"])

    # ---- phase B: graph reasoning + fused extend projection + residual ----
    flops_b = (2 * N * C_red * C_node * (C_node + C_red + C_in)
               + 2 * N * HW * C_in * C_node)
    bytes_b = (N * C_red * C_node * 4 + N * C_node * HW * 2
               + 2 * N * C_in * HW * 4
               + params["wn_t"].size * 4 + params["wf"].size * 4
               + params["we"].size * 2 + params["b_dec"].size * 4
               + params["bn"].size * 4)
    out32 = pl.pallas_call(
        functools.partial(_glore_decode_kernel, c_red=C_red),
        out_shape=jax.ShapeDtypeStruct((N, C_in, HW), jnp.float32),
        grid=(N, K),
        in_specs=[
            pl.BlockSpec((None, C_red, C_node), lambda n, k: (n, 0, 0)),  # V
            pl.BlockSpec((None, C_node, hw_t), lambda n, k: (n, 0, k)),   # t
            pl.BlockSpec((None, C_in, hw_t), lambda n, k: (n, 0, k)),     # x f32
            pl.BlockSpec((C_node, C_node), lambda n, k: (0, 0)),          # Wn_f^T
            pl.BlockSpec((1, C_node), lambda n, k: (0, 0)),               # bn row
            pl.BlockSpec((C_red, C_red), lambda n, k: (0, 0)),            # Wf
            pl.BlockSpec((C_red + C_in, 1), lambda n, k: (0, 0)),         # [bf; be]
            pl.BlockSpec((C_in, C_red), lambda n, k: (0, 0)),             # We
        ],
        out_specs=pl.BlockSpec((None, C_in, hw_t), lambda n, k: (n, 0, k)),
        scratch_shapes=[pltpu.VMEM((C_in, C_node), jnp.bfloat16)],
        compiler_params=cparams,
        cost_estimate=pl.CostEstimate(
            flops=int(flops_b), transcendentals=0,
            bytes_accessed=int(bytes_b)),
    )(v_arr, t_arr, x32, params["wn_t"], params["bn"], params["wf"],
      params["b_dec"], params["we"])

    return out32.reshape(N, C_in, H, W)


# ---------------- parameter construction (deterministic) ----------------

def _fold_conv_bn(w, b, gamma, beta, mean, var, eps=1e-5):
    """Fold conv bias + inference BatchNorm into the weight and a bias."""
    s = gamma / jnp.sqrt(var + eps)
    w_f = w * s[:, None]                   # scale folded into the weight rows
    b_f = beta + s * (b - mean)
    return w_f, b_f


def make_params(key, c_in, c_red, c_node):
    ks = jax.random.split(key, 30)
    it = iter(ks)

    def conv_bn(c_out, c_in_):
        w = 0.1 * jax.random.normal(next(it), (c_out, c_in_), jnp.float32)
        b = 0.1 * jax.random.normal(next(it), (c_out,), jnp.float32)
        gamma = 1.0 + 0.1 * jax.random.normal(next(it), (c_out,), jnp.float32)
        beta = 0.1 * jax.random.normal(next(it), (c_out,), jnp.float32)
        mean = 0.1 * jax.random.normal(next(it), (c_out,), jnp.float32)
        var = 1.0 + 0.1 * jnp.abs(jax.random.normal(next(it), (c_out,), jnp.float32))
        return _fold_conv_bn(w, b, gamma, beta, mean, var)

    wphy, bphy = conv_bn(c_red, c_in)      # phy
    wth, bth = conv_bn(c_node, c_in)       # theta
    wn, bn = conv_bn(c_node, c_node)       # reasoning.node_conv
    wf, bf = conv_bn(c_red, c_red)         # reasoning.feat_conv
    we, be = conv_bn(c_in, c_red)          # extend (no ReLU)

    return {
        # packed phy+theta weight: one bf16 MXU pass in the encode kernel
        "w_enc": jnp.concatenate([wphy, wth], axis=0).astype(jnp.bfloat16),
        # extend weight (bf16 matmul operand)
        "we": we.astype(jnp.bfloat16),
        # tiny graph-conv weights stay f32; node weight pre-transposed so the
        # kernel contraction is MXU-natural (V @ Wn_f^T == V @ wn_t)
        "wn_t": wn.T,
        "wf": wf,
        # packed bias vectors (fewer DMA descriptors per step)
        "b_enc": jnp.concatenate([bphy, bth])[:, None],    # (C_red+C_node, 1)
        "bn": bn[None, :],                                 # (1, C_node) row
        "b_dec": jnp.concatenate([bf, be])[:, None],       # (C_red+C_in, 1)
    }


# ------- plain-JAX reference (same folded math & precision policy) -------

def glore_reference(x_nchw, params):
    f32 = jnp.float32
    N, C_in, H, W = x_nchw.shape
    HW = H * W
    C_red = params["wf"].shape[0]
    C_node = params["wn_t"].shape[0]

    x32 = x_nchw.reshape(N, C_in, HW).astype(f32)
    x16 = x32.astype(jnp.bfloat16)
    b_dec = params["b_dec"]
    bf_, be_ = b_dec[:C_red], b_dec[C_red:]

    rt = jnp.einsum("oc,ncl->nol", params["w_enc"], x16,
                    preferred_element_type=f32) + params["b_enc"][None]
    rt = jnp.maximum(rt, 0.0)
    r16 = rt[:, :C_red, :].astype(jnp.bfloat16)
    t16 = rt[:, C_red:, :].astype(jnp.bfloat16)
    v = jnp.einsum("nrl,nkl->nrk", r16, t16, preferred_element_type=f32)

    n_t = jnp.einsum("nrk,ko->nro", v, params["wn_t"],
                     preferred_element_type=f32) + params["bn"][None]
    v1 = jnp.maximum(n_t, 0.0) + v
    v2 = jnp.maximum(jnp.einsum("or,nrk->nok", params["wf"], v1,
                                preferred_element_type=f32) + bf_[None], 0.0)
    w_eff = jnp.einsum("or,nrk->nok", params["we"], v2.astype(jnp.bfloat16),
                       preferred_element_type=f32).astype(jnp.bfloat16)
    y = jnp.einsum("nok,nkl->nol", w_eff, t16,
                   preferred_element_type=f32) + be_[None]
    out = jnp.maximum(y + x32, 0.0)
    return out.reshape(N, C_in, H, W)


if __name__ == "__main__":
    key = jax.random.PRNGKey(0)
    k_x, k_p = jax.random.split(key)

    N, C_in, H, W = 2, 16, 16, 16        # input x: (2, 16, 16, 16), NCHW
    C_red, C_node = 8, 8

    x = jax.random.normal(k_x, (N, C_in, H, W), jnp.float32)
    params = make_params(k_p, C_in, C_red, C_node)

    out = glore_forward(x, params)
    out = jax.block_until_ready(out)

    ref = glore_reference(x, params)
    assert out.shape == (N, C_in, H, W)
    assert jnp.allclose(out, ref, rtol=1e-2, atol=1e-2), "mismatch vs reference"

    print("KERNEL_OK")
</pallas_src>

<mosaic_0001>
module attributes {stable_mosaic.version = 11 : i64} {
  func.func @_glore_encode_kernel(%arg0: i32, %arg1: i32, %arg2: memref<1x16x256xbf16, #tpu.memory_space<vmem>>, %arg3: memref<16x16xbf16, #tpu.memory_space<vmem>>, %arg4: memref<16x1xf32, #tpu.memory_space<vmem>>, %arg5: memref<1x8x256xbf16, #tpu.memory_space<vmem>>, %arg6: memref<1x8x8xf32, #tpu.memory_space<vmem>>) attributes {dimension_semantics = [#tpu.dimension_semantics<parallel>, #tpu.dimension_semantics<arbitrary>], iteration_bounds = array<i64: 2, 1>, scalar_prefetch = 0 : i64, scratch_operands = 0 : i64, tpu.core_type = #tpu.core_type<tc>, window_params = [{transform_indices = @transform_0, window_bounds = array<i64: 1, 16, 256>}, {pipeline_mode = #tpu.pipeline_mode<synchronous>, transform_indices = @transform_1, window_bounds = array<i64: 16, 16>}, {pipeline_mode = #tpu.pipeline_mode<synchronous>, transform_indices = @transform_2, window_bounds = array<i64: 16, 1>}, {transform_indices = @transform_3, window_bounds = array<i64: 1, 8, 256>}, {transform_indices = @transform_4, window_bounds = array<i64: 1, 8, 8>}]} {
    %c0 = arith.constant 0 : index
    %c0_0 = arith.constant 0 : index
    %c0_1 = arith.constant 0 : index
    %0 = vector.load %arg2[%c0, %c0_0, %c0_1] : memref<1x16x256xbf16, #tpu.memory_space<vmem>>, vector<1x16x256xbf16>
    %1 = vector.shape_cast %0 : vector<1x16x256xbf16> to vector<16x256xbf16>
    %c0_2 = arith.constant 0 : index
    %c0_3 = arith.constant 0 : index
    %2 = vector.load %arg3[%c0_2, %c0_3] : memref<16x16xbf16, #tpu.memory_space<vmem>>, vector<16x16xbf16>
    %cst = arith.constant dense<0.000000e+00> : vector<16x256xf32>
    %3 = tpu.matmul %2, %1, %cst {dimension_numbers = #tpu.dot_dimension_numbers<[1], [0], [0], [1], [0, 0, 1, 1], [], []>} : vector<16x16xbf16>, vector<16x256xbf16>, vector<16x256xf32> -> vector<16x256xf32>
    %c0_4 = arith.constant 0 : index
    %c0_5 = arith.constant 0 : index
    %4 = vector.load %arg4[%c0_4, %c0_5] : memref<16x1xf32, #tpu.memory_space<vmem>>, vector<16x1xf32>
    %5 = vector.broadcast %4 : vector<16x1xf32> to vector<16x256xf32>
    %6 = arith.addf %3, %5 : vector<16x256xf32>
    %cst_6 = arith.constant 0.000000e+00 : f32
    %7 = vector.broadcast %cst_6 : f32 to vector<16x256xf32>
    %8 = arith.maximumf %6, %7 : vector<16x256xf32>
    %9 = vector.extract_strided_slice %8 {offsets = [0, 0], sizes = [8, 256], strides = [1, 1]} : vector<16x256xf32> to vector<8x256xf32>
    %10 = arith.truncf %9 : vector<8x256xf32> to vector<8x256xbf16>
    %11 = vector.extract_strided_slice %8 {offsets = [8, 0], sizes = [8, 256], strides = [1, 1]} : vector<16x256xf32> to vector<8x256xf32>
    %12 = arith.truncf %11 : vector<8x256xf32> to vector<8x256xbf16>
    %c0_7 = arith.constant 0 : index
    %c0_8 = arith.constant 0 : index
    %c0_9 = arith.constant 0 : index
    %13 = vector.load %arg5[%c0_7, %c0_8, %c0_9] : memref<1x8x256xbf16, #tpu.memory_space<vmem>>, vector<1x8x256xbf16>
    %14 = vector.shape_cast %13 : vector<1x8x256xbf16> to vector<8x256xbf16>
    %15 = vector.shape_cast %12 : vector<8x256xbf16> to vector<1x8x256xbf16>
    tpu.vector_store %arg5[%c0_7, %c0_8, %c0_9], %15 {strides = array<i32>} : memref<1x8x256xbf16, #tpu.memory_space<vmem>>, vector<1x8x256xbf16>,
    %cst_10 = arith.constant dense<0.000000e+00> : vector<8x8xf32>
    %16 = tpu.matmul %10, %12, %cst_10 {dimension_numbers = #tpu.dot_dimension_numbers<[1], [1], [0], [0], [0, 0, 1, 0], [], []>} : vector<8x256xbf16>, vector<8x256xbf16>, vector<8x8xf32> -> vector<8x8xf32>
    %c0_i32 = arith.constant 0 : i32
    %17 = arith.cmpi eq, %arg1, %c0_i32 : i32
    %18 = arith.extui %17 : i1 to i32
    %c0_i32_11 = arith.constant 0 : i32
    %19 = arith.cmpi ne, %18, %c0_i32_11 : i32
    scf.if %19 {
      %cst_18 = arith.constant 0.000000e+00 : f32
      %26 = vector.broadcast %cst_18 : f32 to vector<8x8xf32>
      %c0_19 = arith.constant 0 : index
      %c0_20 = arith.constant 0 : index
      %c0_21 = arith.constant 0 : index
      %27 = vector.load %arg6[%c0_19, %c0_20, %c0_21] : memref<1x8x8xf32, #tpu.memory_space<vmem>>, vector<1x8x8xf32>
      %28 = vector.shape_cast %27 : vector<1x8x8xf32> to vector<8x8xf32>
      %29 = vector.shape_cast %26 : vector<8x8xf32> to vector<1x8x8xf32>
      tpu.vector_store %arg6[%c0_19, %c0_20, %c0_21], %29 {strides = array<i32>} : memref<1x8x8xf32, #tpu.memory_space<vmem>>, vector<1x8x8xf32>,
    } else {
    }
    %c0_12 = arith.constant 0 : index
    %c0_13 = arith.constant 0 : index
    %c0_14 = arith.constant 0 : index
    %20 = vector.load %arg6[%c0_12, %c0_13, %c0_14] : memref<1x8x8xf32, #tpu.memory_space<vmem>>, vector<1x8x8xf32>
    %21 = vector.shape_cast %20 : vector<1x8x8xf32> to vector<8x8xf32>
    %22 = arith.addf %21, %16 : vector<8x8xf32>
    %c0_15 = arith.constant 0 : index
    %c0_16 = arith.constant 0 : index
    %c0_17 = arith.constant 0 : index
    %23 = vector.load %arg6[%c0_15, %c0_16, %c0_17] : memref<1x8x8xf32, #tpu.memory_space<vmem>>, vector<1x8x8xf32>
    %24 = vector.shape_cast %23 : vector<1x8x8xf32> to vector<8x8xf32>
    %25 = vector.shape_cast %22 : vector<8x8xf32> to vector<1x8x8xf32>
    tpu.vector_store %arg6[%c0_15, %c0_16, %c0_17], %25 {strides = array<i32>} : memref<1x8x8xf32, #tpu.memory_space<vmem>>, vector<1x8x8xf32>,
    return
  }
  func.func @transform_0(%arg0: i32, %arg1: i32) -> (i32, i32, i32) {
    %c0_i32 = arith.constant 0 : i32
    %c0_i32_0 = arith.constant 0 : i32
    return %arg0, %c0_i32, %arg1 : i32, i32, i32
  }
  func.func @transform_1(%arg0: i32, %arg1: i32) -> (i32, i32) {
    %c0_i32 = arith.constant 0 : i32
    %c0_i32_0 = arith.constant 0 : i32
    %c0_i32_1 = arith.constant 0 : i32
    return %c0_i32, %c0_i32_0 : i32, i32
  }
  func.func @transform_2(%arg0: i32, %arg1: i32) -> (i32, i32) {
    %c0_i32 = arith.constant 0 : i32
    %c0_i32_0 = arith.constant 0 : i32
    %c0_i32_1 = arith.constant 0 : i32
    return %c0_i32, %c0_i32_0 : i32, i32
  }
  func.func @transform_3(%arg0: i32, %arg1: i32) -> (i32, i32, i32) {
    %c0_i32 = arith.constant 0 : i32
    %c0_i32_0 = arith.constant 0 : i32
    return %arg0, %c0_i32, %arg1 : i32, i32, i32
  }
  func.func @transform_4(%arg0: i32, %arg1: i32) -> (i32, i32, i32) {
    %c0_i32 = arith.constant 0 : i32
    %c0_i32_0 = arith.constant 0 : i32
    %c0_i32_1 = arith.constant 0 : i32
    return %arg0, %c0_i32, %c0_i32_0 : i32, i32, i32
  }
}

module attributes {stable_mosaic.version = 11 : i64} {
  func.func @_glore_decode_kernel(%arg0: i32, %arg1: i32, %arg2: memref<1x8x8xf32, #tpu.memory_space<vmem>>, %arg3: memref<1x8x256xbf16, #tpu.memory_space<vmem>>, %arg4: memref<1x16x256xf32, #tpu.memory_space<vmem>>, %arg5: memref<8x8xf32, #tpu.memory_space<vmem>>, %arg6: memref<1x8xf32, #tpu.memory_space<vmem>>, %arg7: memref<8x8xf32, #tpu.memory_space<vmem>>, %arg8: memref<24x1xf32, #tpu.memory_space<vmem>>, %arg9: memref<16x8xbf16, #tpu.memory_space<vmem>>, %arg10: memref<1x16x256xf32, #tpu.memory_space<vmem>>, %arg11: memref<16x8xbf16, #tpu.memory_space<vmem>>) attributes {dimension_semantics = [#tpu.dimension_semantics<parallel>, #tpu.dimension_semantics<arbitrary>], iteration_bounds = array<i64: 2, 1>, scalar_prefetch = 0 : i64, scratch_operands = 1 : i64, tpu.core_type = #tpu.core_type<tc>, window_params = [{transform_indices = @transform_0, window_bounds = array<i64: 1, 8, 8>}, {transform_indices = @transform_1, window_bounds = array<i64: 1, 8, 256>}, {transform_indices = @transform_2, window_bounds = array<i64: 1, 16, 256>}, {pipeline_mode = #tpu.pipeline_mode<synchronous>, transform_indices = @transform_3, window_bounds = array<i64: 8, 8>}, {pipeline_mode = #tpu.pipeline_mode<synchronous>, transform_indices = @transform_4, window_bounds = array<i64: 1, 8>}, {pipeline_mode = #tpu.pipeline_mode<synchronous>, transform_indices = @transform_5, window_bounds = array<i64: 8, 8>}, {pipeline_mode = #tpu.pipeline_mode<synchronous>, transform_indices = @transform_6, window_bounds = array<i64: 24, 1>}, {pipeline_mode = #tpu.pipeline_mode<synchronous>, transform_indices = @transform_7, window_bounds = array<i64: 16, 8>}, {transform_indices = @transform_8, window_bounds = array<i64: 1, 16, 256>}]} {
    %c0 = arith.constant 0 : index
    %c0_0 = arith.constant 0 : index
    %0 = vector.load %arg8[%c0, %c0_0] : memref<24x1xf32, #tpu.memory_space<vmem>>, vector<24x1xf32>
    %c0_i32 = arith.constant 0 : i32
    %1 = arith.cmpi eq, %arg1, %c0_i32 : i32
    %2 = arith.extui %1 : i1 to i32
    %c0_i32_1 = arith.constant 0 : i32
    %3 = arith.cmpi ne, %2, %c0_i32_1 : i32
    scf.if %3 {
      %c0_14 = arith.constant 0 : index
      %c0_15 = arith.constant 0 : index
      %c0_16 = arith.constant 0 : index
      %19 = vector.load %arg2[%c0_14, %c0_15, %c0_16] : memref<1x8x8xf32, #tpu.memory_space<vmem>>, vector<1x8x8xf32>
      %20 = vector.shape_cast %19 : vector<1x8x8xf32> to vector<8x8xf32>
      %c0_17 = arith.constant 0 : index
      %c0_18 = arith.constant 0 : index
      %21 = vector.load %arg5[%c0_17, %c0_18] : memref<8x8xf32, #tpu.memory_space<vmem>>, vector<8x8xf32>
      %cst_19 = arith.constant dense<0.000000e+00> : vector<8x8xf32>
      %22 = tpu.matmul %20, %21, %cst_19 {dimension_numbers = #tpu.dot_dimension_numbers<[1], [0], [0], [1], [0, 0, 1, 1], [], []>} : vector<8x8xf32>, vector<8x8xf32>, vector<8x8xf32> -> vector<8x8xf32>
      %c0_20 = arith.constant 0 : index
      %c0_21 = arith.constant 0 : index
      %23 = vector.load %arg6[%c0_20, %c0_21] : memref<1x8xf32, #tpu.memory_space<vmem>>, vector<1x8xf32>
      %24 = vector.broadcast %23 : vector<1x8xf32> to vector<8x8xf32>
      %25 = arith.addf %22, %24 : vector<8x8xf32>
      %cst_22 = arith.constant 0.000000e+00 : f32
      %26 = vector.broadcast %cst_22 : f32 to vector<8x8xf32>
      %27 = arith.maximumf %25, %26 : vector<8x8xf32>
      %28 = arith.addf %27, %20 : vector<8x8xf32>
      %c0_23 = arith.constant 0 : index
      %c0_24 = arith.constant 0 : index
      %29 = vector.load %arg7[%c0_23, %c0_24] : memref<8x8xf32, #tpu.memory_space<vmem>>, vector<8x8xf32>
      %cst_25 = arith.constant dense<0.000000e+00> : vector<8x8xf32>
      %30 = tpu.matmul %29, %28, %cst_25 {dimension_numbers = #tpu.dot_dimension_numbers<[1], [0], [0], [1], [0, 0, 1, 1], [], []>} : vector<8x8xf32>, vector<8x8xf32>, vector<8x8xf32> -> vector<8x8xf32>
      %31 = vector.extract_strided_slice %0 {offsets = [0, 0], sizes = [8, 1], strides = [1, 1]} : vector<24x1xf32> to vector<8x1xf32>
      %32 = vector.broadcast %31 : vector<8x1xf32> to vector<8x8xf32>
      %33 = arith.addf %30, %32 : vector<8x8xf32>
      %cst_26 = arith.constant 0.000000e+00 : f32
      %34 = vector.broadcast %cst_26 : f32 to vector<8x8xf32>
      %35 = arith.maximumf %33, %34 : vector<8x8xf32>
      %c0_27 = arith.constant 0 : index
      %c0_28 = arith.constant 0 : index
      %36 = vector.load %arg9[%c0_27, %c0_28] : memref<16x8xbf16, #tpu.memory_space<vmem>>, vector<16x8xbf16>
      %37 = arith.truncf %35 : vector<8x8xf32> to vector<8x8xbf16>
      %cst_29 = arith.constant dense<0.000000e+00> : vector<16x8xf32>
      %38 = tpu.matmul %36, %37, %cst_29 {dimension_numbers = #tpu.dot_dimension_numbers<[1], [0], [0], [1], [0, 0, 1, 1], [], []>} : vector<16x8xbf16>, vector<8x8xbf16>, vector<16x8xf32> -> vector<16x8xf32>
      %39 = arith.truncf %38 : vector<16x8xf32> to vector<16x8xbf16>
      %c0_30 = arith.constant 0 : index
      %c0_31 = arith.constant 0 : index
      %40 = vector.load %arg11[%c0_30, %c0_31] : memref<16x8xbf16, #tpu.memory_space<vmem>>, vector<16x8xbf16>
      tpu.vector_store %arg11[%c0_30, %c0_31], %39 {strides = array<i32>} : memref<16x8xbf16, #tpu.memory_space<vmem>>, vector<16x8xbf16>,
    } else {
    }
    %c0_2 = arith.constant 0 : index
    %c0_3 = arith.constant 0 : index
    %4 = vector.load %arg11[%c0_2, %c0_3] : memref<16x8xbf16, #tpu.memory_space<vmem>>, vector<16x8xbf16>
    %c0_4 = arith.constant 0 : index
    %c0_5 = arith.constant 0 : index
    %c0_6 = arith.constant 0 : index
    %5 = vector.load %arg3[%c0_4, %c0_5, %c0_6] : memref<1x8x256xbf16, #tpu.memory_space<vmem>>, vector<1x8x256xbf16>
    %6 = vector.shape_cast %5 : vector<1x8x256xbf16> to vector<8x256xbf16>
    %cst = arith.constant dense<0.000000e+00> : vector<16x256xf32>
    %7 = tpu.matmul %4, %6, %cst {dimension_numbers = #tpu.dot_dimension_numbers<[1], [0], [0], [1], [0, 0, 1, 1], [], []>} : vector<16x8xbf16>, vector<8x256xbf16>, vector<16x256xf32> -> vector<16x256xf32>
    %8 = vector.extract_strided_slice %0 {offsets = [8, 0], sizes = [16, 1], strides = [1, 1]} : vector<24x1xf32> to vector<16x1xf32>
    %9 = vector.broadcast %8 : vector<16x1xf32> to vector<16x256xf32>
    %10 = arith.addf %7, %9 : vector<16x256xf32>
    %c0_7 = arith.constant 0 : index
    %c0_8 = arith.constant 0 : index
    %c0_9 = arith.constant 0 : index
    %11 = vector.load %arg4[%c0_7, %c0_8, %c0_9] : memref<1x16x256xf32, #tpu.memory_space<vmem>>, vector<1x16x256xf32>
    %12 = vector.shape_cast %11 : vector<1x16x256xf32> to vector<16x256xf32>
    %13 = arith.addf %10, %12 : vector<16x256xf32>
    %cst_10 = arith.constant 0.000000e+00 : f32
    %14 = vector.broadcast %cst_10 : f32 to vector<16x256xf32>
    %15 = arith.maximumf %13, %14 : vector<16x256xf32>
    %c0_11 = arith.constant 0 : index
    %c0_12 = arith.constant 0 : index
    %c0_13 = arith.constant 0 : index
    %16 = vector.load %arg10[%c0_11, %c0_12, %c0_13] : memref<1x16x256xf32, #tpu.memory_space<vmem>>, vector<1x16x256xf32>
    %17 = vector.shape_cast %16 : vector<1x16x256xf32> to vector<16x256xf32>
    %18 = vector.shape_cast %15 : vector<16x256xf32> to vector<1x16x256xf32>
    tpu.vector_store %arg10[%c0_11, %c0_12, %c0_13], %18 {strides = array<i32>} : memref<1x16x256xf32, #tpu.memory_space<vmem>>, vector<1x16x256xf32>,
    return
  }
  func.func @transform_0(%arg0: i32, %arg1: i32) -> (i32, i32, i32) {
    %c0_i32 = arith.constant 0 : i32
    %c0_i32_0 = arith.constant 0 : i32
    %c0_i32_1 = arith.constant 0 : i32
    return %arg0, %c0_i32, %c0_i32_0 : i32, i32, i32
  }
  func.func @transform_1(%arg0: i32, %arg1: i32) -> (i32, i32, i32) {
    %c0_i32 = arith.constant 0 : i32
    %c0_i32_0 = arith.constant 0 : i32
    return %arg0, %c0_i32, %arg1 : i32, i32, i32
  }
  func.func @transform_2(%arg0: i32, %arg1: i32) -> (i32, i32, i32) {
    %c0_i32 = arith.constant 0 : i32
    %c0_i32_0 = arith.constant 0 : i32
    return %arg0, %c0_i32, %arg1 : i32, i32, i32
  }
  func.func @transform_3(%arg0: i32, %arg1: i32) -> (i32, i32) {
    %c0_i32 = arith.constant 0 : i32
    %c0_i32_0 = arith.constant 0 : i32
    %c0_i32_1 = arith.constant 0 : i32
    return %c0_i32, %c0_i32_0 : i32, i32
  }
  func.func @transform_4(%arg0: i32, %arg1: i32) -> (i32, i32) {
    %c0_i32 = arith.constant 0 : i32
    %c0_i32_0 = arith.constant 0 : i32
    %c0_i32_1 = arith.constant 0 : i32
    return %c0_i32, %c0_i32_0 : i32, i32
  }
  func.func @transform_5(%arg0: i32, %arg1: i32) -> (i32, i32) {
    %c0_i32 = arith.constant 0 : i32
    %c0_i32_0 = arith.constant 0 : i32
    %c0_i32_1 = arith.constant 0 : i32
    return %c0_i32, %c0_i32_0 : i32, i32
  }
  func.func @transform_6(%arg0: i32, %arg1: i32) -> (i32, i32) {
    %c0_i32 = arith.constant 0 : i32
    %c0_i32_0 = arith.constant 0 : i32
    %c0_i32_1 = arith.constant 0 : i32
    return %c0_i32, %c0_i32_0 : i32, i32
  }
  func.func @transform_7(%arg0: i32, %arg1: i32) -> (i32, i32) {
    %c0_i32 = arith.constant 0 : i32
    %c0_i32_0 = arith.constant 0 : i32
    %c0_i32_1 = arith.constant 0 : i32
    return %c0_i32, %c0_i32_0 : i32, i32
  }
  func.func @transform_8(%arg0: i32, %arg1: i32) -> (i32, i32, i32) {
    %c0_i32 = arith.constant 0 : i32
    %c0_i32_0 = arith.constant 0 : i32
    return %arg0, %c0_i32, %arg1 : i32, i32, i32
  }
}

</mosaic_0001>

<bundles_post_ra>
// kernel: glore_forward.2
= control target key start
LH: loop header
LB: loop body
LE: loop exit
PB: predicated region body
PF: predicated region fallthrough
CT: control target
= control target key end

     0   :  { %s612_s15 = smov 0   ;;  %s614_s16 = smov 0   ;;  %s661_s0 = inlined_call_operand.vmem [shape: bf16[2,16,256], index: 0, kind: input, shape index: {}]   ;;  %s662_s1 = inlined_call_operand.vmem [shape: bf16[16,16], index: 1, kind: input, shape index: {}]   ;;  %s663_s2 = inlined_call_operand.vmem [shape: f32[16,1], index: 2, kind: input, shape index: {}]   ;;  %s664_s3 = inlined_call_operand.vmem [shape: bf16[2,8,256], index: 3, kind: output, shape index: {0}]   ;;  %s665_s4 = inlined_call_operand.vmem [shape: f32[2,8,8], index: 4, kind: output, shape index: {1}]  }
   0x1   :  { %s616_s17 = smov 0  }
   0x2 LB: > { %s27_s18 = sadd.s32 1, %s579_s16  ;;  %p514_p0 = scmp.ge.s32.totalorder %s583_s17, 1  ;;  %s583_s17 = sphi %s616_s17, %s15_s17   ;;  %s579_s16 = sphi %s614_s16, %s667_s16   ;;  %s575_s15 = sphi %s612_s15, %s666_s15  }
   0x3   : > { %p29_p1 = scmp.ge.s32.totalorder %s27_s18, 2  ;;  %p186_p2 = scmp.lt.s32.totalorder %s583_s17, 3 }
   0x5   : > { %s669_s18 = smov (%p29_p1, %s27_s18), 0  ;;  %p187_p3 = pnand %p514_p0, %p186_p2 }
   0x6   : > { %p225_p4 = scmp.lt.s32.totalorder (!%p187_p3), %s575_s15, 1  ;;  %v585_v0 = vmov (!%p187_p3), 0   ;;  %v254_v1 = vld [vmem:[%s663_s2 + $0x8] sm:$0xff] (!%p187_p3)  ;;  %v253_v2 = vld [vmem:[%s663_s2] sm:$0xff] (!%p187_p3)  ;;  %vm280_vm0 = vcmask (!%p187_p3), 130048   ;;  %vm386_vm1 = vcmask (!%p187_p3), 64512  }
   0x7   : > { %190 = sbr.rel (%p187_p3) target bundleno = 466 (0x1d2), region = 32  ;;  %316 = vmatprep.mubr.bf16.mxu0 (!%p187_p3), %v585_v0  ;;  %556 = vset.pattern.permute.xlu0 (!%p187_p3), %v585_v0  ;;  %v560_v5 = vld [vmem:[%s662_s1] sm:$0xff] (!%p187_p3)   ;;  %v586_v25 = vmov (!%p187_p3), 0.0  }
   0x8   : > { %262 = vperm.xlu0 (!%p187_p3), %556, %v254_v1  }
   0xc   : > { %257 = vperm.xlu0 (!%p187_p3), %556, %v253_v2  }
   0xe   : > { %s671_s15 = smov (!%p225_p4, %s575_s15), 1 }
   0xf   : > { %s527_s23 = sshll.u32 %s671_s15, 4  ;;  %s528_s29 = sshll.u32 %s671_s15, 3 }
  0x10   : > { %s232_s26 = scalar_lea.vmem %s661_s0, %s527_s23  ;;  %s242_s6 = scalar_lea.vmem %s664_s3, %s528_s29 }
  0x11   : > { %v557_v3 = vld [vmem:[%s232_s26 + $0x4] ss:$8 sps:$4 sm:$0xff]   ;;  %v559_v4 = vld [vmem:[%s232_s26] ss:$8 sps:$4 sm:$0xff]   ;;  %s247_s9 = scalar_lea.vmem %s665_s4, %s528_s29 }
  0x12   : > { %284 = vmatprep.subr.bf16.mxu0 %v557_v3  ;;  %387 = vst.msk [vmem:[%s247_s9] sm:$0xff] %vm386_vm1, %v586_v25 }
  0x13   : > { %285 = vmatpush1.bf16.msra.mxu0 %v559_v4 }
  0x16   : > { %523 = vmatmul.mubr.msk.bf16.vlgmr.msra.gmra.mrb[0].mxu0 %vm280_vm0, %v560_v5 }
  0x19   : > { %v388_v26 = vld [vmem:[%s247_s9] sm:$0xff] }
  0x87   : > { %v263_v6 = vpop.permute.xlu0 %262 }
  0x8b   : > { %v258_v7 = vpop.permute.xlu0 %257 }
  0xe9   : > { %v318_v8 = vpop.f32.mrb[0].mxu0 }
  0xea   : > { %v320_v9 = vpop.f32.mrb[1].mxu0  ;;  %v319_v19 = vadd.f32 %v318_v8, %v258_v7 }
  0xeb   : > { %v321_v10 = vadd.f32 %v320_v9, %v258_v7  ;;  %v322_v11 = vpop.f32.mrb[2].mxu0 }
  0xec   : > { %v323_v12 = vadd.f32 %v322_v11, %v263_v6  ;;  %v324_v13 = vpop.f32.mrb[3].mxu0  ;;  %v327_v23 = vmax.f32 %v319_v19, 0.0 }
  0xed   : > { %v325_v14 = vadd.f32 %v324_v13, %v263_v6  ;;  %v328_v15 = vmax.f32 %v321_v10, 0.0 }
  0xee   : > { %v329_v16 = vmax.f32 %v323_v12, 0.0  ;;  %v331_v24 = vpack.c.bf16 %v327_v23, %v327_v23 }
  0xef   : > { %v330_v17 = vmax.f32 %v325_v14, 0.0  ;;  %v332_v18 = vpack.c.bf16 %v328_v15, %v328_v15 }
  0xf0   : > { %v333_v22 = vpack.c.bf16 %v329_v16, %v329_v16 }
  0xf1   : > { %v529_v20 = vpack.c.bf16 %v330_v17, %v329_v16  ;;  %374 = vmatprep.mubr.bf16.mxu1 %v332_v18  ;;  %v334_v21 = vpack.c.bf16 %v330_v17, %v330_v17 }
  0xf3   : > { %342 = vmatprep.subr.bf16.mxu1 %v334_v21  ;;  %341 = vst [vmem:[%s242_s6] sm:$0xff] %v529_v20 }
  0xf4   : > { %343 = vmatpush1.bf16.xpose.msra.mxu1 %v333_v22 }
  0xfb   : > { %375 = vmatmul.mubr.bf16.vlgmr.msra.gmra.mrb[0].mxu1 %v331_v24 }
 0x1ce   : > { %v376_v27 = vpop.f32.mrb[0].mxu1 }
 0x1cf   : > { %v389_v28 = vadd.f32 %v388_v26, %v376_v27  ;;  %v378_v29 = vpop.f32.mrb[1].mxu1 }
 0x1d0   : > { %v379_v30 = vpop.f32.mrb[2].mxu1 }
 0x1d1   : > { %391 = vst.msk [vmem:[%s247_s9] sm:$0xff] %vm386_vm1, %v389_v28  ;;  %v380_v31 = vpop.f32.mrb[3].mxu1 }
 0x1d2 PF: > { %s15_s17 = sadd.s32 1, %s583_s17   ;;  %s666_s15 = smov %s579_s16 }
 0x1d3   : > { %p12_p5 = scmp.ge.s32.totalorder %s15_s17, 4   ;;  %s667_s16 = smov %s669_s18 }
 0x1d5   :  { %14 = sbr.rel (!%p12_p5) target bundleno = 2 (0x2), region = 78 }

// kernel: glore_forward.3
= control target key start
LH: loop header
LB: loop body
LE: loop exit
PB: predicated region body
PF: predicated region fallthrough
CT: control target
= control target key end

     0   :  { %s984_s27 = smov 0   ;;  %s986_s28 = smov 0   ;;  %s1053_s0 = inlined_call_operand.vmem [shape: f32[2,8,8], index: 0, kind: input, shape index: {}]   ;;  %s1054_s1 = inlined_call_operand.vmem [shape: bf16[2,8,256], index: 1, kind: input, shape index: {}]   ;;  %s1055_s2 = inlined_call_operand.vmem [shape: f32[2,16,256], index: 2, kind: input, shape index: {}]   ;;  %s1056_s3 = inlined_call_operand.vmem [shape: f32[8,8], index: 3, kind: input, shape index: {}]   ;;  %s1057_s4 = inlined_call_operand.vmem [shape: f32[1,8], index: 4, kind: input, shape index: {}]   ;;  %s1058_s5 = inlined_call_operand.vmem [shape: f32[8,8], index: 5, kind: input, shape index: {}]   ;;  %s1059_s6 = inlined_call_operand.vmem [shape: f32[24,1], index: 6, kind: input, shape index: {}]   ;;  %s1060_s7 = inlined_call_operand.vmem [shape: bf16[16,8], index: 7, kind: input, shape index: {}]   ;;  %s1061_s8 = inlined_call_operand.vmem [shape: f32[2,16,256], index: 8, kind: output, shape index: {}]  }
   0x1   :  { %s988_s29 = smov 0  }
   0x2 LB: > { %s30_s30 = sadd.s32 1, %s930_s28  ;;  %p837_p0 = scmp.ge.s32.totalorder %s934_s29, 1  ;;  %s934_s29 = sphi %s988_s29, %s18_s29   ;;  %s930_s28 = sphi %s986_s28, %s1063_s28   ;;  %s926_s27 = sphi %s984_s27, %s1062_s27  }
   0x3   : > { %p32_p1 = scmp.ge.s32.totalorder %s30_s30, 2  ;;  %p309_p2 = scmp.lt.s32.totalorder %s934_s29, 3 }
   0x5   : > { %s1065_s30 = smov (%p32_p1, %s30_s30), 0  ;;  %p310_p3 = pnand %p837_p0, %p309_p2 }
   0x6   : > { %v407_v0 = vld [vmem:[%s1056_s3] sm:$0xff] (!%p310_p3)  ;;  %p364_p4 = scmp.lt.s32.totalorder (!%p310_p3), %s926_s27, 1  ;;  %v936_v1 = vmov (!%p310_p3), 0.0   ;;  %vm937_vm0 = vmmov (!%p310_p3), 0   ;;  %vm415_vm1 = vcmask (!%p310_p3), 64512   ;;  %v938_v4 = vmov (!%p310_p3), 0  }
   0x7   : > { %313 = sbr.rel (%p310_p3) target bundleno = 905 (0x389), region = 52  ;;  %865 = vmatprep.subr.mxu0 (!%p310_p3), %v936_v1  ;;  %867 = vmatprep.mubr.msk.f32.mxu0 (!%p310_p3), %vm937_vm0, %v936_v1  ;;  %v399_v3 = vld [vmem:[%s1059_s6] sm:$0xff] (!%p310_p3)  ;;  %v400_v5 = vld [vmem:[%s1059_s6 + $0x8] sm:$0xff] (!%p310_p3)  ;;  %vm582_vm2 = vcmask (!%p310_p3), 1043456   ;;  %v401_v25 = vld [vmem:[%s1059_s6 + $0x10] sm:$0xff] (!%p310_p3) }
   0x8   : > { %866 = vmatpush3.msra.mxu0 (!%p310_p3), %v407_v0  ;;  %870 = vmatprep.subr.mxu1 (!%p310_p3), %v936_v1  ;;  %v845_v6 = vld [vmem:[%s1057_s4] ss:$0 sm:$0xff] (!%p310_p3) }
   0x9   : > { %872 = vmatprep.mubr.msk.f32.mxu1 (!%p310_p3), %vm937_vm0, %v936_v1  ;;  %875 = vmatprep.subr.bf16.mxu0 (!%p310_p3), %v936_v1  ;;  %v491_v12 = vld [vmem:[%s1058_s5] sm:$0xff] (!%p310_p3) }
   0xa   : > { %908 = vset.pattern.permute.xlu0 (!%p310_p3), %v938_v4  ;;  %909 = vset.pattern.permute.xlu1 (!%p310_p3), %v938_v4  ;;  %v911_v22 = vld [vmem:[%s1060_s7] sm:$0xff] (!%p310_p3)  }
   0xb   : > { %494 = vperm.xlu0 (!%p310_p3), %908, %v399_v3   ;;  %638 = vperm.xlu1 (!%p310_p3), %909, %v401_v25  }
   0xe   : > { %s1067_s27 = smov (!%p364_p4, %s926_s27), 1 }
   0xf   : > { %s838_s11 = sshll.u32 %s1067_s27, 3  ;;  %633 = vperm.xlu0 %908, %v400_v5   ;;  %s857_s12 = sshll.u32 %s1067_s27, 5 }
  0x10   : > { %s367_s14 = scalar_lea.vmem %s1053_s0, %s838_s11  ;;  %s376_s25 = scalar_lea.vmem %s1054_s1, %s838_s11 }
  0x11   : > { %v406_v2 = vld [vmem:[%s367_s14] sm:$0xff]  ;;  %s386_s15 = scalar_lea.vmem %s1055_s2, %s857_s12  ;;  %s396_s17 = scalar_lea.vmem %s1061_s8, %s857_s12 }
  0x12   : > { %868 = vmatmul.mubr.msk.f32.vlgmr.msra.gmra.mrb[0].mxu0 %vm415_vm1, %v406_v2  ;;  %v630_v13 = vld [vmem:[%s376_s25] sm:$0xff]  ;;  %v701_v38 = vld [vmem:[%s386_s15 + $0x8] sm:$0xff]  ;;  %v702_v41 = vld [vmem:[%s386_s15 + $0x10] sm:$0xff] }
  0x13   : > { %877 = vmatprep.mubr.msk.bf16.mxu0 %vm937_vm0, %v936_v1  ;;  %v851_v14 = vcombine.high %v630_v13, %v630_v13  ;;  %v850_v23 = vcombine.low %v630_v13, %v630_v13  ;;  %v700_v34 = vld [vmem:[%s386_s15] sm:$0xff]  ;;  %v703_v45 = vld [vmem:[%s386_s15 + $0x18] sm:$0xff] }
  0x15   : > { %v652_v24 = vsel %vm582_vm2, %v850_v23, 0 }
  0x8a   : > { %v495_v15 = vpop.permute.xlu0 %494  ;;  %v639_v35 = vpop.permute.xlu1 %638 }
  0x8e   : > { %v634_v32 = vpop.permute.xlu0 %633 }
  0xe5   : > { %v485_v7 = vpop.f32.mrb[0].mxu0 }
  0xe6   : > { %v486_v8 = vadd.f32 %v845_v6, %v485_v7  ;;  %v869_v9 = vpop.f32.mrb[1].mxu0 }
  0xe8   : > { %v489_v10 = vmax.f32 %v486_v8, 0.0 }
  0xea   : > { %v490_v11 = vadd.f32 %v489_v10, %v406_v2 }
  0xec   : > { %871 = vmatpush3.msra.mxu1 %v490_v11 }
  0xed   : > { %873 = vmatmul.mubr.msk.f32.vlgmr.msra.gmra.mrb[0].mxu1 %vm415_vm1, %v491_v12  ;;  %852 = vmatprep.subr.msk.bf16.mxu1 %vm582_vm2, %v851_v14 }
  0xee   : > { %689 = vmatprep.mubr.bf16.mxu1 %v938_v4  ;;  %658 = vmatpush1.bf16.msra.mxu1 %v652_v24 }
 0x1c0   : > { %v566_v16 = vpop.f32.mrb[0].mxu1 }
 0x1c1   : > { %v567_v17 = vadd.f32 %v566_v16, %v495_v15  ;;  %v874_v18 = vpop.f32.mrb[1].mxu1 }
 0x1c3   : > { %v570_v19 = vmax.f32 %v567_v17, 0.0 }
 0x1c5   : > { %v573_v20 = vpack.c.bf16 %v570_v19, %v570_v19 }
 0x1c7   : > { %v584_v21 = vsel %vm582_vm2, %v573_v20, 0 }
 0x1c8   : > { %876 = vmatpush3.bf16.msra.mxu0 %v584_v21 }
 0x1cb   : > { %878 = vmatmul.mubr.msk.bf16.vlgmr.msra.gmra.mrb[4].mxu0 %vm415_vm1, %v911_v22 }
 0x29e   : > { %v620_v26 = vpop.f32.mrb[4].mxu0 }
 0x29f   : > { %v879_v27 = vpop.f32.mrb[5].mxu0 }
 0x2a0   : > { %v623_v28 = vpop.f32.mrb[6].mxu0 }
 0x2a1   : > { %v627_v29 = vpack.c.bf16 %v623_v28, %v620_v26  ;;  %v880_v30 = vpop.f32.mrb[7].mxu0 }
 0x2a3   : > { %628 = vst.msk [vmem:[#allocation2] sm:$0xff] %vm415_vm1, %v627_v29 }
 0x2aa   : > { %v629_v31 = vld [vmem:[#allocation2] sm:$0xff] }
 0x2ab   : > { %853 = vmatmul.mubr.msk.bf16.vlgmr.msra.gmra.mrb[4].mxu1 %vm415_vm1, %v629_v31 }
 0x37e   : > { %v691_v33 = vpop.f32.mrb[4].mxu1 }
 0x37f   : > { %v692_v36 = vadd.f32 %v691_v33, %v634_v32  ;;  %v693_v37 = vpop.f32.mrb[5].mxu1 }
 0x380   : > { %v694_v39 = vadd.f32 %v693_v37, %v634_v32  ;;  %v695_v40 = vpop.f32.mrb[6].mxu1 }
 0x381   : > { %v704_v42 = vadd.f32 %v700_v34, %v692_v36  ;;  %v696_v43 = vadd.f32 %v695_v40, %v639_v35  ;;  %v697_v44 = vpop.f32.mrb[7].mxu1 }
 0x382   : > { %v705_v46 = vadd.f32 %v701_v38, %v694_v39  ;;  %v698_v47 = vadd.f32 %v697_v44, %v639_v35 }
 0x383   : > { %v708_v48 = vmax.f32 %v704_v42, 0.0  ;;  %v706_v49 = vadd.f32 %v702_v41, %v696_v43 }
 0x384   : > { %v709_v50 = vmax.f32 %v705_v46, 0.0  ;;  %v707_v51 = vadd.f32 %v703_v45, %v698_v47 }
 0x385   : > { %712 = vst [vmem:[%s396_s17] sm:$0xff] %v708_v48  ;;  %v710_v52 = vmax.f32 %v706_v49, 0.0 }
 0x386   : > { %713 = vst [vmem:[%s396_s17 + $0x8] sm:$0xff] %v709_v50  ;;  %v711_v53 = vmax.f32 %v707_v51, 0.0 }
 0x387   : > { %714 = vst [vmem:[%s396_s17 + $0x10] sm:$0xff] %v710_v52 }
 0x388   : > { %715 = vst [vmem:[%s396_s17 + $0x18] sm:$0xff] %v711_v53 }
 0x389 PF: > { %s18_s29 = sadd.s32 1, %s934_s29   ;;  %s1062_s27 = smov %s930_s28 }
 0x38a   : > { %p15_p5 = scmp.ge.s32.totalorder %s18_s29, 4   ;;  %s1063_s28 = smov %s1065_s30 }
 0x38c   :  { %17 = sbr.rel (!%p15_p5) target bundleno = 2 (0x2), region = 92 }

</bundles_post_ra>
